<compile_context>
chip_gen: v5e
topology: v5e:2x2
jax: 0.10.0
libtpu: 0.0.40
codegen_flags: <defaults>
</compile_context>

<pallas_src>
import jax
import jax.numpy as jnp
from jax.experimental import pallas as pl
from jax.experimental.pallas import tpu as pltpu

_VMEM_LIMIT_BYTES = 48 * 1024 * 1024  # raise scoped VMEM above the 16/32 MiB default


# ----------------------------------------------------------------------------
# Parameter construction / preparation
# ----------------------------------------------------------------------------
def init_params(key, input_size, hidden_size, output_size, n_layers):
    """Raw f32 parameters mirroring the PyTorch module (eval mode)."""
    H, D, O, L = hidden_size, input_size, output_size, n_layers
    ks = jax.random.split(key, 16)
    u = lambda k, shape, bound: jax.random.uniform(k, shape, jnp.float32, -bound, bound)
    b_attn = 1.0 / jnp.sqrt(2.0 * H)
    b_pre = 1.0 / jnp.sqrt(float(D + H))
    b_gru = 1.0 / jnp.sqrt(float(H))
    b_out = 1.0 / jnp.sqrt(float(H))
    return {
        # Attn: nn.Linear(2H, H) split into hidden-half / encoder-half, plus v
        "wa_h": u(ks[0], (H, H), b_attn),
        "wa_e": u(ks[1], (H, H), b_attn),
        "ba": u(ks[2], (1, H), b_attn),
        "v": jax.random.normal(ks[3], (1, H), jnp.float32) / jnp.sqrt(float(H)),
        # pre_linear: Linear(D + H, H) followed by BatchNorm1d (eval) + ReLU
        "wp": u(ks[4], (D + H, H), b_pre),
        "bp": u(ks[5], (1, H), b_pre),
        # BN params / running stats randomised so the folding path is exercised
        "bn_g": 0.5 + jax.random.uniform(ks[6], (1, H), jnp.float32),
        "bn_b": 0.1 * jax.random.normal(ks[7], (1, H), jnp.float32),
        "bn_m": 0.1 * jax.random.normal(ks[8], (1, H), jnp.float32),
        "bn_v": 0.5 + jax.random.uniform(ks[9], (1, H), jnp.float32),
        # GRU(H, H, n_layers): gate order (r, z, n) fused along lanes
        "wih": u(ks[10], (L, H, 3 * H), b_gru),
        "whh": u(ks[11], (L, H, 3 * H), b_gru),
        "bih": u(ks[12], (L, 1, 3 * H), b_gru),
        "bhh": u(ks[13], (L, 1, 3 * H), b_gru),
        # out: Linear(H, O)
        "wo": u(ks[14], (H, O), b_out),
        "bo": u(ks[15], (1, O), b_out),
    }


def prepare_params(raw, mxu_dtype=jnp.bfloat16):
    """One-time prep: fold eval-mode BN into pre_linear, build block-diagonal
    fused GRU weights (one MXU push per layer), cast MXU operands to bf16."""
    H = raw["wa_h"].shape[0]
    L = raw["wih"].shape[0]
    # Fold BatchNorm (eval mode) into the pre_linear affine:  y = xW*s + ((b-m)*s + beta)
    bn_scale = raw["bn_g"] / jnp.sqrt(raw["bn_v"] + 1e-5)            # [1, H]
    wp = raw["wp"] * bn_scale                                        # [D+H, H]
    bp = (raw["bp"] - raw["bn_m"]) * bn_scale + raw["bn_b"]          # [1, H]
    # Block-diagonal fused GRU weight: [x ; h] @ [[Wih, 0], [0, Whh]] -> [gx | gh]
    w_gru = jnp.zeros((L, 2 * H, 6 * H), jnp.float32)
    w_gru = w_gru.at[:, :H, : 3 * H].set(raw["wih"])
    w_gru = w_gru.at[:, H:, 3 * H:].set(raw["whh"])
    b_gru = jnp.concatenate([raw["bih"], raw["bhh"]], axis=-1)       # [L, 1, 6H]
    cast = lambda a: a.astype(mxu_dtype)
    return {
        "wa_e": cast(raw["wa_e"]),
        "ba": raw["ba"],
        "wa_h": cast(raw["wa_h"]),
        "v": raw["v"],
        "wp": cast(wp),
        "bp": bp,
        "w_gru": cast(w_gru),
        "b_gru": b_gru,
        "wo": cast(raw["wo"]),
        "bo": raw["bo"],
    }


# ----------------------------------------------------------------------------
# One-time-per-sequence kernel: encoder-side attention keys
#   enc_proj = encoder_outputs @ Wa_e + b_a   (loop-invariant across steps)
# ----------------------------------------------------------------------------
def _attn_key_proj_kernel(enc_flat_ref, wa_e_ref, ba_ref, out_ref):
    proj = jnp.dot(enc_flat_ref[...], wa_e_ref[...],
                   preferred_element_type=jnp.float32)
    out_ref[...] = (proj + ba_ref[...]).astype(out_ref.dtype)


def precompute_attn_keys(enc, params):
    """enc: [T, B, H] (MXU dtype). Reshape to [T*B, H] in HBM (free) so the
    kernel never merges tiled dims; returns enc_proj [T, B, H] in enc.dtype."""
    T, B, H = enc.shape
    enc_flat = enc.reshape(T * B, H)
    vmem = pl.BlockSpec(memory_space=pltpu.MemorySpace.VMEM)
    out = pl.pallas_call(
        _attn_key_proj_kernel,
        out_shape=jax.ShapeDtypeStruct((T * B, H), enc.dtype),
        in_specs=[vmem, vmem, vmem],
        out_specs=vmem,
        compiler_params=pltpu.CompilerParams(vmem_limit_bytes=_VMEM_LIMIT_BYTES),
    )(enc_flat, params["wa_e"], params["ba"])
    return out.reshape(T, B, H)


# ----------------------------------------------------------------------------
# Fused decode kernel: one grid step == one decode token.
# Weights / enc / enc_proj stay VMEM-resident (constant block index); the hidden
# state lives in the VMEM-resident `hidden_ref` output block across all steps.
# ----------------------------------------------------------------------------
def _decoder_rollout_kernel(
    motion_ref,     # [1, B, D]      (block for step s)
    h0_ref,         # [L, B, H]      initial hidden state, f32
    enc_ref,        # [T, B, H]      MXU dtype
    enc_proj_ref,   # [T, B, H]      enc @ Wa_e + b_a, MXU dtype
    wa_h_ref,       # [H, H]         MXU dtype
    v_ref,          # [1, H]         f32
    wp_ref,         # [D+H, H]       MXU dtype (BN folded in)
    bp_ref,         # [1, H]         f32       (BN folded in)
    w_gru_ref,      # [L, 2H, 6H]    MXU dtype (block-diagonal, gates r,z,n)
    b_gru_ref,      # [L, 1, 6H]     f32       ([bih | bhh])
    wo_ref,         # [H, O]         MXU dtype
    bo_ref,         # [1, O]         f32
    out_ref,        # [1, B, O]      per-step output block
    hidden_ref,     # [L, B, H]      VMEM-resident carry (constant block index)
    attn_ref,       # [1, B, T]      per-step attention block (lane-dense T)
):
    L, B, H = h0_ref.shape
    dt = wa_h_ref.dtype  # MXU operand dtype (bf16); elementwise math stays f32

    # Load the initial hidden state into the resident carry on the first step.
    @pl.when(pl.program_id(0) == 0)
    def _():
        hidden_ref[...] = h0_ref[...]

    hid = hidden_ref[L - 1]                                           # [B, H] f32

    # ---- attention energies, native [T, B, H] layout (no enc transpose) ----
    h_part = jnp.dot(hid.astype(dt), wa_h_ref[...],
                     preferred_element_type=jnp.float32)              # [B, H]
    energy = jnp.tanh(h_part[None] + enc_proj_ref[...].astype(jnp.float32))
    scores = jnp.sum(energy * v_ref[...][None], axis=-1)              # [T, B]

    # ---- softmax over T (leading axis) --------------------------------------
    m = jnp.max(scores, axis=0, keepdims=True)                        # [1, B]
    p = jnp.exp(scores - m)                                           # [T, B]
    denom = jnp.sum(p, axis=0, keepdims=True)                         # [1, B]
    attn_tb = p * pl.reciprocal(denom, approx=True)                   # [T, B]

    # Lane-dense output layout [B, T]; the [B,1,T] view is free in the wrapper.
    attn_ref[0] = jnp.transpose(attn_tb, (1, 0))

    # ---- context: reduce over the leading T axis (VPU accumulate) -----------
    context = jnp.sum(attn_tb[:, :, None] * enc_ref[...].astype(jnp.float32),
                      axis=0)                                         # [B, H]

    # ---- pre_linear (BatchNorm folded into wp/bp) + ReLU ---------------------
    rnn_in = jnp.concatenate([motion_ref[0].astype(dt), context.astype(dt)],
                             axis=1)                                  # [B, D+H]
    pre = (jnp.dot(rnn_in, wp_ref[...], preferred_element_type=jnp.float32)
           + bp_ref[...])                                             # [B, H]
    x = jnp.maximum(pre, 0.0)

    # ---- GRU stack: ONE MXU push per layer on block-diagonal fused weights --
    for l in range(L):
        h_prev = hidden_ref[l]                                        # [B, H]
        xh = jnp.concatenate([x, h_prev], axis=1).astype(dt)          # [B, 2H]
        g = (jnp.dot(xh, w_gru_ref[l], preferred_element_type=jnp.float32)
             + b_gru_ref[l])                                          # [B, 6H]
        gx = g[:, 0:3 * H]
        gh = g[:, 3 * H:6 * H]
        r = jax.nn.sigmoid(gx[:, 0:H] + gh[:, 0:H])
        z = jax.nn.sigmoid(gx[:, H:2 * H] + gh[:, H:2 * H])
        n = jnp.tanh(gx[:, 2 * H:3 * H] + r * gh[:, 2 * H:3 * H])     # bias inside r-term
        h_new = (1.0 - z) * n + z * h_prev
        hidden_ref[l] = h_new
        x = h_new

    # ---- output projection ---------------------------------------------------
    out_ref[0] = (jnp.dot(x.astype(dt), wo_ref[...],
                          preferred_element_type=jnp.float32)
                  + bo_ref[...]).astype(out_ref.dtype)


def bahdanau_decoder_rollout(motion_seq, last_hidden, enc, params, enc_proj=None):
    """Teacher-forced decode of all steps in ONE pallas_call.
    motion_seq: [S, B, D]. Returns (out_seq [S,B,O], hidden [L,B,H], attn [S,B,T])."""
    S, B, D = motion_seq.shape
    L, _, H = last_hidden.shape
    T = enc.shape[0]
    O = params["wo"].shape[1]

    if enc_proj is None:
        enc_proj = precompute_attn_keys(enc, params)

    def _resident(arr):  # whole array, constant block index -> stays in VMEM
        nd = arr.ndim
        return pl.BlockSpec(arr.shape, lambda s, _nd=nd: (0,) * _nd)

    inputs = (
        motion_seq, last_hidden, enc, enc_proj,
        params["wa_h"], params["v"], params["wp"], params["bp"],
        params["w_gru"], params["b_gru"], params["wo"], params["bo"],
    )
    in_specs = [pl.BlockSpec((1, B, D), lambda s: (s, 0, 0))]
    in_specs += [_resident(a) for a in inputs[1:]]

    out_specs = (
        pl.BlockSpec((1, B, O), lambda s: (s, 0, 0)),   # per-step output
        pl.BlockSpec((L, B, H), lambda s: (0, 0, 0)),   # resident hidden carry
        pl.BlockSpec((1, B, T), lambda s: (s, 0, 0)),   # per-step attn (lane-dense)
    )
    out_shape = (
        jax.ShapeDtypeStruct((S, B, O), jnp.float32),
        jax.ShapeDtypeStruct((L, B, H), jnp.float32),
        jax.ShapeDtypeStruct((S, B, T), jnp.float32),
    )

    out_seq, hidden, attn_seq = pl.pallas_call(
        _decoder_rollout_kernel,
        grid=(S,),
        out_shape=out_shape,
        in_specs=in_specs,
        out_specs=out_specs,
        compiler_params=pltpu.CompilerParams(
            dimension_semantics=("arbitrary",),   # serial carry across steps
            vmem_limit_bytes=_VMEM_LIMIT_BYTES,
        ),
    )(*inputs)
    return out_seq, hidden, attn_seq


def bahdanau_decoder_step(motion, last_hidden, enc, params, enc_proj=None):
    """Single decode step (matches the PyTorch forward signature):
    returns (output [B,O], hidden [L,B,H], attn_weights [B,1,T])."""
    out_seq, hidden, attn_seq = bahdanau_decoder_rollout(
        motion[None], last_hidden, enc, params, enc_proj=enc_proj)
    return out_seq[0], hidden, attn_seq[0][:, None, :]


# ----------------------------------------------------------------------------
# Pure-JAX mirror of the PyTorch forward (eval mode, f32) for validation.
# ----------------------------------------------------------------------------
def reference_step(motion, last_hidden, enc, raw):
    L, B, H = last_hidden.shape
    hid = last_hidden[-1]
    enc_bth = jnp.transpose(enc, (1, 0, 2))                           # [B, T, H]
    energy = jnp.tanh((hid @ raw["wa_h"])[:, None, :]
                      + jnp.einsum("bth,hk->btk", enc_bth, raw["wa_e"])
                      + raw["ba"][None])                              # [B, T, H]
    scores = jnp.sum(energy * raw["v"][None], axis=-1)                # [B, T]
    attn_w = jax.nn.softmax(scores, axis=1)
    context = jnp.einsum("bt,bth->bh", attn_w, enc_bth)               # [B, H]
    pre = jnp.concatenate([motion, context], axis=1) @ raw["wp"] + raw["bp"]
    xbn = ((pre - raw["bn_m"]) / jnp.sqrt(raw["bn_v"] + 1e-5)
           * raw["bn_g"] + raw["bn_b"])
    x = jnp.maximum(xbn, 0.0)
    hidden_out = []
    for l in range(L):
        h_prev = last_hidden[l]
        gx = x @ raw["wih"][l] + raw["bih"][l]
        gh = h_prev @ raw["whh"][l] + raw["bhh"][l]
        r = jax.nn.sigmoid(gx[:, 0:H] + gh[:, 0:H])
        z = jax.nn.sigmoid(gx[:, H:2 * H] + gh[:, H:2 * H])
        n = jnp.tanh(gx[:, 2 * H:3 * H] + r * gh[:, 2 * H:3 * H])
        h_new = (1.0 - z) * n + z * h_prev
        hidden_out.append(h_new)
        x = h_new
    out = x @ raw["wo"] + raw["bo"]
    return out, jnp.stack(hidden_out, 0), attn_w[:, None, :]


def reference_rollout(motion_seq, last_hidden, enc, raw):
    h = last_hidden
    outs, attns = [], []
    for s in range(motion_seq.shape[0]):
        o, h, a = reference_step(motion_seq[s], h, enc, raw)
        outs.append(o)
        attns.append(a[:, 0, :])
    return jnp.stack(outs, 0), h, jnp.stack(attns, 0)


if __name__ == "__main__":
    B, T, H = 2, 8, 32
    S = 4                                   # decode steps for the fused rollout
    input_size, output_size, n_layers = 16, 16, 1
    mxu_dtype = jnp.bfloat16

    key = jax.random.PRNGKey(0)
    k_p, k_m, k_h, k_e = jax.random.split(key, 4)
    raw = init_params(k_p, input_size, H, output_size, n_layers)
    params = prepare_params(raw, mxu_dtype=mxu_dtype)

    motion_seq = jax.random.normal(k_m, (S, B, input_size), jnp.float32)
    last_hidden = jax.random.normal(k_h, (n_layers, B, H), jnp.float32)
    enc_f32 = jax.random.normal(k_e, (T, B, H), jnp.float32)
    enc = enc_f32.astype(mxu_dtype)         # MXU-operand storage dtype

    # Encoder-side attention keys: computed ONCE per sequence, reused per step.
    enc_proj = precompute_attn_keys(enc, params)

    # --- single decode step (matches the PyTorch forward) --------------------
    out, hidden, attn_w = jax.block_until_ready(
        bahdanau_decoder_step(motion_seq[0], last_hidden, enc, params,
                              enc_proj=enc_proj))
    ro, rh, ra = reference_step(motion_seq[0], last_hidden, enc_f32, raw)
    assert out.shape == (B, output_size)
    assert hidden.shape == (n_layers, B, H)
    assert attn_w.shape == (B, 1, T)
    tol = dict(rtol=2e-2, atol=2e-2)        # re-validated for bf16 MXU operands
    assert jnp.allclose(out, ro, **tol)
    assert jnp.allclose(hidden, rh, **tol)
    assert jnp.allclose(attn_w, ra, **tol)

    # --- fused multi-step rollout: one pallas_call, weights VMEM-resident ----
    out_seq, hidden_S, attn_seq = jax.block_until_ready(
        bahdanau_decoder_rollout(motion_seq, last_hidden, enc, params,
                                 enc_proj=enc_proj))
    r_out_seq, r_hidden_S, r_attn_seq = reference_rollout(
        motion_seq, last_hidden, enc_f32, raw)
    assert out_seq.shape == (S, B, output_size)
    assert hidden_S.shape == (n_layers, B, H)
    assert attn_seq.shape == (S, B, T)
    assert jnp.allclose(out_seq, r_out_seq, **tol)
    assert jnp.allclose(hidden_S, r_hidden_S, **tol)
    assert jnp.allclose(attn_seq, r_attn_seq, **tol)

    print("KERNEL_OK")
</pallas_src>

<mosaic_0001>
module attributes {stable_mosaic.version = 11 : i64} {
  func.func @_attn_key_proj_kernel(%arg0: memref<16x32xbf16, #tpu.memory_space<vmem>>, %arg1: memref<32x32xbf16, #tpu.memory_space<vmem>>, %arg2: memref<1x32xf32, #tpu.memory_space<vmem>>, %arg3: memref<16x32xbf16, #tpu.memory_space<vmem>>) attributes {dimension_semantics = [], scalar_prefetch = 0 : i64, scratch_operands = 0 : i64, tpu.core_type = #tpu.core_type<tc>} {
    %c0 = arith.constant 0 : index
    %c0_0 = arith.constant 0 : index
    %0 = vector.load %arg0[%c0, %c0_0] : memref<16x32xbf16, #tpu.memory_space<vmem>>, vector<16x32xbf16>
    %c0_1 = arith.constant 0 : index
    %c0_2 = arith.constant 0 : index
    %1 = vector.load %arg1[%c0_1, %c0_2] : memref<32x32xbf16, #tpu.memory_space<vmem>>, vector<32x32xbf16>
    %cst = arith.constant dense<0.000000e+00> : vector<16x32xf32>
    %2 = tpu.matmul %0, %1, %cst {dimension_numbers = #tpu.dot_dimension_numbers<[1], [0], [0], [1], [0, 0, 1, 1], [], []>} : vector<16x32xbf16>, vector<32x32xbf16>, vector<16x32xf32> -> vector<16x32xf32>
    %c0_3 = arith.constant 0 : index
    %c0_4 = arith.constant 0 : index
    %3 = vector.load %arg2[%c0_3, %c0_4] : memref<1x32xf32, #tpu.memory_space<vmem>>, vector<1x32xf32>
    %4 = vector.broadcast %3 : vector<1x32xf32> to vector<16x32xf32>
    %5 = arith.addf %2, %4 : vector<16x32xf32>
    %6 = arith.truncf %5 : vector<16x32xf32> to vector<16x32xbf16>
    %c0_5 = arith.constant 0 : index
    %c0_6 = arith.constant 0 : index
    %7 = vector.load %arg3[%c0_5, %c0_6] : memref<16x32xbf16, #tpu.memory_space<vmem>>, vector<16x32xbf16>
    tpu.vector_store %arg3[%c0_5, %c0_6], %6 {strides = array<i32>} : memref<16x32xbf16, #tpu.memory_space<vmem>>, vector<16x32xbf16>,
    return
  }
}

</mosaic_0001>

<bundles_post_ra>
// kernel: tpu_custom_call.1
= control target key start
LH: loop header
LB: loop body
LE: loop exit
PB: predicated region body
PF: predicated region fallthrough
CT: control target
= control target key end

     0   :  { %8 = vsyncpa [#allocation3], 0  ;;  %s264_s0 = inlined_call_operand.hbm [shape: bf16[16,32], index: 0, kind: input, shape index: {}]   ;;  %s265_s1 = inlined_call_operand.hbm [shape: bf16[32,32], index: 1, kind: input, shape index: {}]   ;;  %s266_s2 = inlined_call_operand.vmem [shape: f32[1,32], index: 2, kind: input, shape index: {}]   ;;  %s267_s3 = inlined_call_operand.hbm [shape: bf16[16,32], index: 3, kind: output, shape index: {}]  }
   0x1   :  { %9 = vsyncpa [#allocation6], 0 }
   0x2   :  { %10 = vsyncpa [#allocation4], 0  ;;  %s15_s14 = sshll.u32 %s264_s0, 4  ;;  %s218_s15 = smov [#allocation2]   ;;  %s16_s14 = int_to_ptr.hbm [resolvable:$true] %s15_s14 }
   0x3   :  { %s17_s16 = sshll.u32 %s218_s15, 4  ;;  %s28_s19 = sshll.u32 %s265_s1, 4  ;;  %s18_s16 = int_to_ptr.vmem [resolvable:$true] %s17_s16  ;;  %s29_s19 = int_to_ptr.hbm [resolvable:$true] %s28_s19 }
   0x4   :  { %s219_s20 = smov 64   ;;  %s220_s21 = smov 4  }
   0x5   :  { %23 = dma.hbm_to_vmem [thread:$0]  %s16_s14, 128, %s18_s16, [#allocation3], %s219_s20, %s219_s20, %s220_s21  }
   0x6   :  { %s221_s22 = smov [#allocation5]  }
   0x7   :  { %s30_s23 = sshll.u32 %s221_s22, 4  ;;  %s31_s23 = int_to_ptr.vmem [resolvable:$true] %s30_s23 }
   0x8   :  { %36 = dma.hbm_to_vmem [thread:$0]  %s29_s19, 256, %s31_s23, [#allocation6], %s219_s20, %s219_s20, %s220_s21  }
   0x9   :  { %212 = dma.done.wait [#allocation3], 128  }
   0xa   :  { %213 = vsyncadd [#allocation3], 4294967168 }
   0xb   :  { %214 = dma.done.wait [#allocation6], 256  }
   0xc   :  { %215 = vsyncadd [#allocation6], 4294967040  ;;  %v133_v0 = vld [vmem:[#allocation5 + $0x8] sm:$0xff]  ;;  %v132_v1 = vld [vmem:[#allocation5] sm:$0xff]  ;;  %vm75_vm0 = vcmask 261120   ;;  %vm95_vm1 = vcmask 257024  }
   0xd   :  { %85 = vmatpush.bf16.msra.mxu0 %v133_v0  ;;  %v131_v2 = vld [vmem:[#allocation2] sm:$0xff]  ;;  %s222_s24 = smov [#allocation7]   ;;  %s104_s28 = sshll.u32 %s267_s3, 4  ;;  %s105_s28 = int_to_ptr.hbm [resolvable:$true] %s104_s28 }
   0xe   :  { %v139_v3 = vld [vmem:[%s266_s2] ss:$0 sm:$0xff]  ;;  %s102_s25 = sshll.u32 %s222_s24, 4  ;;  %s103_s25 = int_to_ptr.vmem [resolvable:$true] %s102_s25 }
  0x11   :  { %86 = vmatpush.bf16.msra.mxu0 %v132_v1 }
  0x14   :  { %130 = vmatmul.msk.bf16.vlgmr.msra.gmra.mxu0 %vm75_vm0, %v131_v2 }
  0x91   :  { %v88_v4 = vpop.f32.mrf.mxu0 }
  0x92   :  { %v89_v5 = vadd.f32 %v139_v3, %v88_v4 }
  0x94   :  { %v93_v6 = vpack.c.bf16 %v89_v5, %v89_v5 }
  0x96   :  { %96 = vst.msk [vmem:[#allocation7] sm:$0xf] %vm95_vm1, %v93_v6 }
  0x99   :  { %v90_v7 = vpop.f32.mrf.mxu0 }
  0x9a   :  { %v91_v8 = vadd.f32 %v139_v3, %v90_v7 }
  0x9c   :  { %v94_v9 = vpack.c.bf16 %v91_v8, %v91_v8 }
  0x9e   :  { %97 = vst.msk [vmem:[#allocation7 + $0x4] sm:$0xf] %vm95_vm1, %v94_v9 }
  0x9f   :  { %110 = dma.vmem_to_hbm [thread:$0]  %s103_s25, 128, %s105_s28, [#allocation4], %s219_s20, %s219_s20, %s220_s21  }
  0xa0   :  { %216 = dma.done.wait [#allocation4], 128  }
  0xa1   :  { %217 = vsyncadd [#allocation4], 4294967168 }
  0xa2   :  { %115 = vsyncpa [#allocation3], 1 }
  0xa3   :  { %116 = vsyncpa [#allocation6], 1 }
  0xa4   :  { %117 = vsyncpa [#allocation4], 1 }

</bundles_post_ra>
